<compile_context>
chip_gen: v7x
topology: tpu7x:2x2x1
jax: 0.10.0
libtpu: 0.0.40
codegen_flags: <defaults>
</compile_context>

<pallas_src>
import math
import functools

import jax
import jax.numpy as jnp
from jax import lax
from jax.experimental import pallas as pl
from jax.experimental.pallas import tpu as pltpu


def _layer_norm(v, g, b, eps=1e-6):
    # single-pass variance: E[x^2] - mu^2 (one fewer full (rows, D) VPU pass)
    mu = jnp.mean(v, axis=-1, keepdims=True)
    ex2 = jnp.mean(v * v, axis=-1, keepdims=True)
    var = ex2 - mu * mu
    return (v - mu) * lax.rsqrt(var + eps) * g + b


# ---------------------------------------------------------------------------
# Pallas kernel: one (batch, query-tile) step per grid point.
# ---------------------------------------------------------------------------
def _mha_kernel(x_ref,
                ln1g_ref, ln1b_ref,
                wq_ref, bq_ref,
                wk_ref, bk_ref,
                wv_ref, bv_ref,
                ln2g_ref, ln2b_ref,
                w1_ref, b1_ref,
                w2_ref, b2_ref,
                o_ref,
                ctx_ref,
                *, num_heads, head_size, tq, seq_len):
    H, Dh, L = num_heads, head_size, seq_len

    x = x_ref[0]                                  # (L, D) f32, full sequence
    D = x.shape[-1]

    h_full = _layer_norm(x, ln1g_ref[...], ln1b_ref[...])    # (L, D) f32
    h16 = h_full.astype(jnp.bfloat16)

    if tq == L:                                   # static (trace-time) branch
        xq = x                                    # query rows of the residual
        hq16 = h16
    else:
        q_start = pl.multiple_of(pl.program_id(1) * tq, tq)
        xq = lax.dynamic_slice_in_dim(x, q_start, tq, axis=0)
        hq16 = lax.dynamic_slice_in_dim(h16, q_start, tq, axis=0)

    # Head-batched projections: (H, rows, D) x (H, D, Dh) -> (H, rows, Dh).
    hq_b = jnp.broadcast_to(hq16[None], (H, tq, D))
    hk_b = jnp.broadcast_to(h16[None], (H, L, D))

    q = jnp.einsum('hld,hdk->hlk', hq_b, wq_ref[...],
                   preferred_element_type=jnp.float32) + bq_ref[...]
    k = jnp.einsum('hld,hdk->hlk', hk_b, wk_ref[...],
                   preferred_element_type=jnp.float32) + bk_ref[...]
    v = jnp.einsum('hld,hdk->hlk', hk_b, wv_ref[...],
                   preferred_element_type=jnp.float32) + bv_ref[...]

    # Fold the 1/sqrt(Dh) scale into Q (O(tq*H*Dh), not O(tq*H*L) on scores).
    q = q * (1.0 / math.sqrt(Dh))

    q16 = q.astype(jnp.bfloat16)
    k16 = k.astype(jnp.bfloat16)
    v16 = v.astype(jnp.bfloat16)

    # Attention scores + softmax (all heads batched, leading batch dim).
    s = jnp.einsum('hqd,hkd->hqk', q16, k16,
                   preferred_element_type=jnp.float32)        # (H, tq, L) f32
    s = s - jnp.max(s, axis=-1, keepdims=True)
    e = jnp.exp(s)
    denom = jnp.sum(e, axis=-1, keepdims=True)                # (H, tq, 1)

    ctx_h = jnp.einsum('hqk,hkd->hqd', e.astype(jnp.bfloat16), v16,
                       preferred_element_type=jnp.float32)    # (H, tq, Dh)
    # Normalize after P@V; reciprocal runs on the EUP slot.
    ctx_h = ctx_h * pl.reciprocal(denom, approx=True)

    # Scatter heads into a lane-contiguous (tq, D) VMEM scratch (no concat).
    for hh in range(H):
        ctx_ref[:, hh * Dh:(hh + 1) * Dh] = ctx_h[hh]

    # TODO(synk): dropout is identity (inference); mask != None path not implemented.
    residual = xq + ctx_ref[...]                               # (tq, D) f32
    o = _layer_norm(residual, ln2g_ref[...], ln2b_ref[...])

    # FFN: Conv1D(k=1) -> exact GELU -> Conv1D(k=1), plus residual.
    o = jnp.dot(o.astype(jnp.bfloat16), w1_ref[...],
                preferred_element_type=jnp.float32) + b1_ref[...]
    o = 0.5 * o * (1.0 + lax.erf(o * (1.0 / math.sqrt(2.0))))  # exact nn.GELU
    o = jnp.dot(o.astype(jnp.bfloat16), w2_ref[...],
                preferred_element_type=jnp.float32) + b2_ref[...]

    o_ref[0] = o + residual


def _pick_tq(L):
    """Query-tile size: full L when small, else a multiple-of-8 divisor."""
    if L <= 256:
        return L
    for cand in (256, 128, 64, 32, 16, 8):
        if L % cand == 0:
            return cand
    return L


# ---------------------------------------------------------------------------
# Wrapper
# ---------------------------------------------------------------------------
def multi_head_attention(x, params, num_heads):
    """x: (B, L, D) float32. params: dict of weights (see init_params)."""
    B, L, D = x.shape
    assert D % num_heads == 0
    Dh = D // num_heads
    tq = _pick_tq(L)
    n_q = L // tq

    # Host-side weight prep: split QKV weights/biases per head and cast the
    # matmul weights to bf16 (halves weight DMA / VMEM; f32 accumulation in
    # the kernel).
    def split_w(w_t):   # (D, D) -> (H, D, Dh)
        return jnp.transpose(w_t.reshape(D, num_heads, Dh),
                             (1, 0, 2)).astype(jnp.bfloat16)

    def split_b(b):     # (1, D) -> (H, 1, Dh)
        return b.reshape(num_heads, Dh)[:, None, :].astype(jnp.float32)

    wq = split_w(params["wq_t"]); bq = split_b(params["bq"])
    wk = split_w(params["wk_t"]); bk = split_b(params["bk"])
    wv = split_w(params["wv_t"]); bv = split_b(params["bv"])
    w1 = params["w1_t"].astype(jnp.bfloat16)
    w2 = params["w2_t"].astype(jnp.bfloat16)

    vec = lambda: pl.BlockSpec((1, D), lambda b, qi: (0, 0))
    matD = lambda: pl.BlockSpec((D, D), lambda b, qi: (0, 0))
    matH = lambda: pl.BlockSpec((num_heads, D, Dh), lambda b, qi: (0, 0, 0))
    vecH = lambda: pl.BlockSpec((num_heads, 1, Dh), lambda b, qi: (0, 0, 0))

    kernel = functools.partial(_mha_kernel, num_heads=num_heads,
                               head_size=Dh, tq=tq, seq_len=L)

    fn = pl.pallas_call(
        kernel,
        out_shape=jax.ShapeDtypeStruct((B, L, D), jnp.float32),
        grid_spec=pltpu.PrefetchScalarGridSpec(
            num_scalar_prefetch=0,
            grid=(B, n_q),
            in_specs=[
                # Full sequence per batch element (needed for K/V); constant
                # index over the query-tile axis keeps it VMEM-resident.
                pl.BlockSpec((1, L, D), lambda b, qi: (b, 0, 0)),
                vec(), vec(),                  # ln1 gamma / beta
                matH(), vecH(),                # Wq (H,D,Dh), bq (H,1,Dh)
                matH(), vecH(),                # Wk, bk
                matH(), vecH(),                # Wv, bv
                vec(), vec(),                  # ln2 gamma / beta
                matD(), vec(),                 # W1^T, b1
                matD(), vec(),                 # W2^T, b2
            ],
            out_specs=pl.BlockSpec((1, tq, D), lambda b, qi: (b, qi, 0)),
            scratch_shapes=[pltpu.VMEM((tq, D), jnp.float32)],
        ),
        compiler_params=pltpu.CompilerParams(
            dimension_semantics=("parallel", "parallel")),
    )

    return fn(
        x,
        params["ln1_g"], params["ln1_b"],
        wq, bq, wk, bk, wv, bv,
        params["ln2_g"], params["ln2_b"],
        w1, params["b1"],
        w2, params["b2"],
    )


# ---------------------------------------------------------------------------
# Pure-JAX reference (f32, matches the PyTorch module at inference)
# ---------------------------------------------------------------------------
def reference(x, p, num_heads):
    B, L, D = x.shape
    Dh = D // num_heads

    def ln(v, g, b):
        mu = jnp.mean(v, -1, keepdims=True)
        var = jnp.mean((v - mu) ** 2, -1, keepdims=True)
        return (v - mu) / jnp.sqrt(var + 1e-6) * g + b

    h = ln(x, p["ln1_g"], p["ln1_b"])
    q = h @ p["wq_t"] + p["bq"]
    k = h @ p["wk_t"] + p["bk"]
    v = h @ p["wv_t"] + p["bv"]
    q = q.reshape(B, L, num_heads, Dh).transpose(0, 2, 1, 3)
    k = k.reshape(B, L, num_heads, Dh).transpose(0, 2, 1, 3)
    v = v.reshape(B, L, num_heads, Dh).transpose(0, 2, 1, 3)
    s = jnp.einsum("bhqd,bhkd->bhqk", q, k) / math.sqrt(Dh)
    pbs = jax.nn.softmax(s, axis=-1)
    ctx = jnp.einsum("bhqk,bhkd->bhqd", pbs, v).transpose(0, 2, 1, 3).reshape(B, L, D)
    residual = x + ctx
    o = ln(residual, p["ln2_g"], p["ln2_b"])
    o = o @ p["w1_t"] + p["b1"]
    o = jax.nn.gelu(o, approximate=False)
    o = o @ p["w2_t"] + p["b2"] + residual
    return o


# ---------------------------------------------------------------------------
# Deterministic parameter init
# ---------------------------------------------------------------------------
def init_params(key, dim):
    keys = jax.random.split(key, 10)
    scale = 1.0 / math.sqrt(dim)

    def mat(k):  # stored already transposed: (in_dim, out_dim)
        return jax.random.normal(k, (dim, dim), jnp.float32) * scale

    def vec(k):
        return jax.random.normal(k, (1, dim), jnp.float32) * 0.02

    return {
        "ln1_g": jnp.ones((1, dim), jnp.float32),
        "ln1_b": jnp.zeros((1, dim), jnp.float32),
        "wq_t": mat(keys[0]), "bq": vec(keys[1]),
        "wk_t": mat(keys[2]), "bk": vec(keys[3]),
        "wv_t": mat(keys[4]), "bv": vec(keys[5]),
        "ln2_g": jnp.ones((1, dim), jnp.float32),
        "ln2_b": jnp.zeros((1, dim), jnp.float32),
        "w1_t": mat(keys[6]), "b1": vec(keys[7]),
        "w2_t": mat(keys[8]), "b2": vec(keys[9]),
    }


if __name__ == "__main__":
    B, L, D, H = 2, 8, 32, 4

    key = jax.random.PRNGKey(0)
    kx, kp = jax.random.split(key)
    x = jax.random.normal(kx, (B, L, D), jnp.float32)
    params = init_params(kp, D)

    out = multi_head_attention(x, params, num_heads=H)
    out = jax.block_until_ready(out)

    ref = reference(x, params, H)
    assert out.shape == (B, L, D)

    # bf16 MXU operands (f32 accumulation) + approx reciprocal -> looser
    # tolerance than the pure-f32 version.
    max_abs = float(jnp.max(jnp.abs(out - ref)))
    rel_fro = float(jnp.linalg.norm(out - ref) / jnp.linalg.norm(ref))
    assert max_abs < 0.25 and rel_fro < 0.05, (
        f"max_abs={max_abs}, rel_fro={rel_fro}")

    print("KERNEL_OK")
</pallas_src>

<mosaic_0001>
module attributes {stable_mosaic.version = 11 : i64} {
  func.func @_mha_kernel(%arg0: i32, %arg1: i32, %arg2: memref<1x8x32xf32, #tpu.memory_space<vmem>>, %arg3: memref<1x32xf32, #tpu.memory_space<vmem>>, %arg4: memref<1x32xf32, #tpu.memory_space<vmem>>, %arg5: memref<4x32x8xbf16, #tpu.memory_space<vmem>>, %arg6: memref<4x1x8xf32, #tpu.memory_space<vmem>>, %arg7: memref<4x32x8xbf16, #tpu.memory_space<vmem>>, %arg8: memref<4x1x8xf32, #tpu.memory_space<vmem>>, %arg9: memref<4x32x8xbf16, #tpu.memory_space<vmem>>, %arg10: memref<4x1x8xf32, #tpu.memory_space<vmem>>, %arg11: memref<1x32xf32, #tpu.memory_space<vmem>>, %arg12: memref<1x32xf32, #tpu.memory_space<vmem>>, %arg13: memref<32x32xbf16, #tpu.memory_space<vmem>>, %arg14: memref<1x32xf32, #tpu.memory_space<vmem>>, %arg15: memref<32x32xbf16, #tpu.memory_space<vmem>>, %arg16: memref<1x32xf32, #tpu.memory_space<vmem>>, %arg17: memref<1x8x32xf32, #tpu.memory_space<vmem>>, %arg18: memref<8x32xf32, #tpu.memory_space<vmem>>) attributes {dimension_semantics = [#tpu.dimension_semantics<parallel>, #tpu.dimension_semantics<parallel>], iteration_bounds = array<i64: 2, 1>, scalar_prefetch = 0 : i64, scratch_operands = 1 : i64, tpu.core_type = #tpu.core_type<tc>, window_params = [{transform_indices = @transform_0, window_bounds = array<i64: 1, 8, 32>}, {pipeline_mode = #tpu.pipeline_mode<synchronous>, transform_indices = @transform_1, window_bounds = array<i64: 1, 32>}, {pipeline_mode = #tpu.pipeline_mode<synchronous>, transform_indices = @transform_2, window_bounds = array<i64: 1, 32>}, {pipeline_mode = #tpu.pipeline_mode<synchronous>, transform_indices = @transform_3, window_bounds = array<i64: 4, 32, 8>}, {pipeline_mode = #tpu.pipeline_mode<synchronous>, transform_indices = @transform_4, window_bounds = array<i64: 4, 1, 8>}, {pipeline_mode = #tpu.pipeline_mode<synchronous>, transform_indices = @transform_5, window_bounds = array<i64: 4, 32, 8>}, {pipeline_mode = #tpu.pipeline_mode<synchronous>, transform_indices = @transform_6, window_bounds = array<i64: 4, 1, 8>}, {pipeline_mode = #tpu.pipeline_mode<synchronous>, transform_indices = @transform_7, window_bounds = array<i64: 4, 32, 8>}, {pipeline_mode = #tpu.pipeline_mode<synchronous>, transform_indices = @transform_8, window_bounds = array<i64: 4, 1, 8>}, {pipeline_mode = #tpu.pipeline_mode<synchronous>, transform_indices = @transform_9, window_bounds = array<i64: 1, 32>}, {pipeline_mode = #tpu.pipeline_mode<synchronous>, transform_indices = @transform_10, window_bounds = array<i64: 1, 32>}, {pipeline_mode = #tpu.pipeline_mode<synchronous>, transform_indices = @transform_11, window_bounds = array<i64: 32, 32>}, {pipeline_mode = #tpu.pipeline_mode<synchronous>, transform_indices = @transform_12, window_bounds = array<i64: 1, 32>}, {pipeline_mode = #tpu.pipeline_mode<synchronous>, transform_indices = @transform_13, window_bounds = array<i64: 32, 32>}, {pipeline_mode = #tpu.pipeline_mode<synchronous>, transform_indices = @transform_14, window_bounds = array<i64: 1, 32>}, {transform_indices = @transform_15, window_bounds = array<i64: 1, 8, 32>}]} {
    %c0 = arith.constant 0 : index
    %c0_0 = arith.constant 0 : index
    %c0_1 = arith.constant 0 : index
    %0 = vector.load %arg2[%c0, %c0_0, %c0_1] : memref<1x8x32xf32, #tpu.memory_space<vmem>>, vector<1x8x32xf32>
    %1 = vector.shape_cast %0 : vector<1x8x32xf32> to vector<8x32xf32>
    %c0_2 = arith.constant 0 : index
    %c0_3 = arith.constant 0 : index
    %2 = vector.load %arg3[%c0_2, %c0_3] : memref<1x32xf32, #tpu.memory_space<vmem>>, vector<1x32xf32>
    %c0_4 = arith.constant 0 : index
    %c0_5 = arith.constant 0 : index
    %3 = vector.load %arg4[%c0_4, %c0_5] : memref<1x32xf32, #tpu.memory_space<vmem>>, vector<1x32xf32>
    %cst = arith.constant dense<0.000000e+00> : vector<8xf32>
    %4 = vector.multi_reduction <add>, %1, %cst [1] : vector<8x32xf32> to vector<8xf32>
    %5 = vector.shape_cast %4 : vector<8xf32> to vector<8x1xf32>
    %cst_6 = arith.constant 3.200000e+01 : f32
    %6 = vector.broadcast %cst_6 : f32 to vector<8x1xf32>
    %7 = arith.divf %5, %6 : vector<8x1xf32>
    %8 = arith.mulf %1, %1 : vector<8x32xf32>
    %cst_7 = arith.constant dense<0.000000e+00> : vector<8xf32>
    %9 = vector.multi_reduction <add>, %8, %cst_7 [1] : vector<8x32xf32> to vector<8xf32>
    %10 = vector.shape_cast %9 : vector<8xf32> to vector<8x1xf32>
    %cst_8 = arith.constant 3.200000e+01 : f32
    %11 = vector.broadcast %cst_8 : f32 to vector<8x1xf32>
    %12 = arith.divf %10, %11 : vector<8x1xf32>
    %13 = arith.mulf %7, %7 : vector<8x1xf32>
    %14 = arith.subf %12, %13 : vector<8x1xf32>
    %15 = vector.broadcast %7 : vector<8x1xf32> to vector<8x32xf32>
    %16 = arith.subf %1, %15 : vector<8x32xf32>
    %cst_9 = arith.constant 9.99999997E-7 : f32
    %17 = vector.broadcast %cst_9 : f32 to vector<8x1xf32>
    %18 = arith.addf %14, %17 : vector<8x1xf32>
    %19 = math.rsqrt %18 : vector<8x1xf32>
    %20 = vector.broadcast %19 : vector<8x1xf32> to vector<8x32xf32>
    %21 = arith.mulf %16, %20 : vector<8x32xf32>
    %22 = vector.broadcast %2 : vector<1x32xf32> to vector<8x32xf32>
    %23 = arith.mulf %21, %22 : vector<8x32xf32>
    %24 = vector.broadcast %3 : vector<1x32xf32> to vector<8x32xf32>
    %25 = arith.addf %23, %24 : vector<8x32xf32>
    %26 = arith.truncf %25 : vector<8x32xf32> to vector<8x32xbf16>
    %27 = vector.shape_cast %26 : vector<8x32xbf16> to vector<1x8x32xbf16>
    %28 = vector.shape_cast %27 : vector<1x8x32xbf16> to vector<1x8x32xbf16>
    %29 = vector.broadcast %28 : vector<1x8x32xbf16> to vector<4x8x32xbf16>
    %30 = vector.shape_cast %26 : vector<8x32xbf16> to vector<1x8x32xbf16>
    %31 = vector.shape_cast %30 : vector<1x8x32xbf16> to vector<1x8x32xbf16>
    %32 = vector.broadcast %31 : vector<1x8x32xbf16> to vector<4x8x32xbf16>
    %c0_10 = arith.constant 0 : index
    %c0_11 = arith.constant 0 : index
    %c0_12 = arith.constant 0 : index
    %33 = vector.load %arg5[%c0_10, %c0_11, %c0_12] : memref<4x32x8xbf16, #tpu.memory_space<vmem>>, vector<4x32x8xbf16>
    "tpu.trace_start"() <{level = 10 : i32, message = "hld,hdk->hlk"}> : () -> ()
    %cst_13 = arith.constant dense<0.000000e+00> : vector<4x8x8xf32>
    %34 = tpu.matmul %29, %33, %cst_13 {dimension_numbers = #tpu.dot_dimension_numbers<[2], [1], [1], [2], [0, 0, 0, 1, 1, 2], [0], [0]>} : vector<4x8x32xbf16>, vector<4x32x8xbf16>, vector<4x8x8xf32> -> vector<4x8x8xf32>
    "tpu.trace_stop"() : () -> ()
    %c0_14 = arith.constant 0 : index
    %c0_15 = arith.constant 0 : index
    %c0_16 = arith.constant 0 : index
    %35 = vector.load %arg6[%c0_14, %c0_15, %c0_16] : memref<4x1x8xf32, #tpu.memory_space<vmem>>, vector<4x1x8xf32>
    %36 = vector.broadcast %35 : vector<4x1x8xf32> to vector<4x8x8xf32>
    %37 = arith.addf %34, %36 : vector<4x8x8xf32>
    %c0_17 = arith.constant 0 : index
    %c0_18 = arith.constant 0 : index
    %c0_19 = arith.constant 0 : index
    %38 = vector.load %arg7[%c0_17, %c0_18, %c0_19] : memref<4x32x8xbf16, #tpu.memory_space<vmem>>, vector<4x32x8xbf16>
    "tpu.trace_start"() <{level = 10 : i32, message = "hld,hdk->hlk"}> : () -> ()
    %cst_20 = arith.constant dense<0.000000e+00> : vector<4x8x8xf32>
    %39 = tpu.matmul %32, %38, %cst_20 {dimension_numbers = #tpu.dot_dimension_numbers<[2], [1], [1], [2], [0, 0, 0, 1, 1, 2], [0], [0]>} : vector<4x8x32xbf16>, vector<4x32x8xbf16>, vector<4x8x8xf32> -> vector<4x8x8xf32>
    "tpu.trace_stop"() : () -> ()
    %c0_21 = arith.constant 0 : index
    %c0_22 = arith.constant 0 : index
    %c0_23 = arith.constant 0 : index
    %40 = vector.load %arg8[%c0_21, %c0_22, %c0_23] : memref<4x1x8xf32, #tpu.memory_space<vmem>>, vector<4x1x8xf32>
    %41 = vector.broadcast %40 : vector<4x1x8xf32> to vector<4x8x8xf32>
    %42 = arith.addf %39, %41 : vector<4x8x8xf32>
    %c0_24 = arith.constant 0 : index
    %c0_25 = arith.constant 0 : index
    %c0_26 = arith.constant 0 : index
    %43 = vector.load %arg9[%c0_24, %c0_25, %c0_26] : memref<4x32x8xbf16, #tpu.memory_space<vmem>>, vector<4x32x8xbf16>
    "tpu.trace_start"() <{level = 10 : i32, message = "hld,hdk->hlk"}> : () -> ()
    %cst_27 = arith.constant dense<0.000000e+00> : vector<4x8x8xf32>
    %44 = tpu.matmul %32, %43, %cst_27 {dimension_numbers = #tpu.dot_dimension_numbers<[2], [1], [1], [2], [0, 0, 0, 1, 1, 2], [0], [0]>} : vector<4x8x32xbf16>, vector<4x32x8xbf16>, vector<4x8x8xf32> -> vector<4x8x8xf32>
    "tpu.trace_stop"() : () -> ()
    %c0_28 = arith.constant 0 : index
    %c0_29 = arith.constant 0 : index
    %c0_30 = arith.constant 0 : index
    %45 = vector.load %arg10[%c0_28, %c0_29, %c0_30] : memref<4x1x8xf32, #tpu.memory_space<vmem>>, vector<4x1x8xf32>
    %46 = vector.broadcast %45 : vector<4x1x8xf32> to vector<4x8x8xf32>
    %47 = arith.addf %44, %46 : vector<4x8x8xf32>
    %cst_31 = arith.constant 0.353553385 : f32
    %48 = vector.broadcast %cst_31 : f32 to vector<4x8x8xf32>
    %49 = arith.mulf %37, %48 : vector<4x8x8xf32>
    %50 = arith.truncf %49 : vector<4x8x8xf32> to vector<4x8x8xbf16>
    %51 = arith.truncf %42 : vector<4x8x8xf32> to vector<4x8x8xbf16>
    %52 = arith.truncf %47 : vector<4x8x8xf32> to vector<4x8x8xbf16>
    "tpu.trace_start"() <{level = 10 : i32, message = "hqd,hkd->hqk"}> : () -> ()
    %cst_32 = arith.constant dense<0.000000e+00> : vector<4x8x8xf32>
    %53 = tpu.matmul %50, %51, %cst_32 {dimension_numbers = #tpu.dot_dimension_numbers<[2], [2], [1], [1], [0, 0, 0, 1, 1, 1], [0], [0]>} : vector<4x8x8xbf16>, vector<4x8x8xbf16>, vector<4x8x8xf32> -> vector<4x8x8xf32>
    "tpu.trace_stop"() : () -> ()
    %cst_33 = arith.constant dense<0xFF800000> : vector<4x8xf32>
    %54 = vector.multi_reduction <maximumf>, %53, %cst_33 [2] : vector<4x8x8xf32> to vector<4x8xf32>
    %55 = vector.shape_cast %54 : vector<4x8xf32> to vector<4x8x1xf32>
    %56 = vector.broadcast %55 : vector<4x8x1xf32> to vector<4x8x8xf32>
    %57 = arith.subf %53, %56 : vector<4x8x8xf32>
    %58 = math.exp %57 : vector<4x8x8xf32>
    %cst_34 = arith.constant dense<0.000000e+00> : vector<4x8xf32>
    %59 = vector.multi_reduction <add>, %58, %cst_34 [2] : vector<4x8x8xf32> to vector<4x8xf32>
    %60 = vector.shape_cast %59 : vector<4x8xf32> to vector<4x8x1xf32>
    %61 = arith.truncf %58 : vector<4x8x8xf32> to vector<4x8x8xbf16>
    "tpu.trace_start"() <{level = 10 : i32, message = "hqk,hkd->hqd"}> : () -> ()
    %cst_35 = arith.constant dense<0.000000e+00> : vector<4x8x8xf32>
    %62 = tpu.matmul %61, %52, %cst_35 {dimension_numbers = #tpu.dot_dimension_numbers<[2], [1], [1], [2], [0, 0, 0, 1, 1, 2], [0], [0]>} : vector<4x8x8xbf16>, vector<4x8x8xbf16>, vector<4x8x8xf32> -> vector<4x8x8xf32>
    "tpu.trace_stop"() : () -> ()
    %63 = tpu.reciprocal %60 {approx = true} : vector<4x8x1xf32> -> vector<4x8x1xf32>
    %64 = vector.broadcast %63 : vector<4x8x1xf32> to vector<4x8x8xf32>
    %65 = arith.mulf %62, %64 : vector<4x8x8xf32>
    %66 = vector.extract_strided_slice %65 {offsets = [0, 0, 0], sizes = [1, 8, 8], strides = [1, 1, 1]} : vector<4x8x8xf32> to vector<1x8x8xf32>
    %67 = vector.shape_cast %66 : vector<1x8x8xf32> to vector<8x8xf32>
    %c0_36 = arith.constant 0 : index
    %c0_37 = arith.constant 0 : index
    %68 = vector.load %arg18[%c0_36, %c0_37] : memref<8x32xf32, #tpu.memory_space<vmem>>, vector<8x8xf32>
    tpu.vector_store %arg18[%c0_36, %c0_37], %67 {strides = array<i32>} : memref<8x32xf32, #tpu.memory_space<vmem>>, vector<8x8xf32>,
    %69 = vector.extract_strided_slice %65 {offsets = [1, 0, 0], sizes = [1, 8, 8], strides = [1, 1, 1]} : vector<4x8x8xf32> to vector<1x8x8xf32>
    %70 = vector.shape_cast %69 : vector<1x8x8xf32> to vector<8x8xf32>
    %c0_38 = arith.constant 0 : index
    %c8 = arith.constant 8 : index
    %71 = vector.load %arg18[%c0_38, %c8] : memref<8x32xf32, #tpu.memory_space<vmem>>, vector<8x8xf32>
    tpu.vector_store %arg18[%c0_38, %c8], %70 {strides = array<i32>} : memref<8x32xf32, #tpu.memory_space<vmem>>, vector<8x8xf32>,
    %72 = vector.extract_strided_slice %65 {offsets = [2, 0, 0], sizes = [1, 8, 8], strides = [1, 1, 1]} : vector<4x8x8xf32> to vector<1x8x8xf32>
    %73 = vector.shape_cast %72 : vector<1x8x8xf32> to vector<8x8xf32>
    %c0_39 = arith.constant 0 : index
    %c16 = arith.constant 16 : index
    %74 = vector.load %arg18[%c0_39, %c16] : memref<8x32xf32, #tpu.memory_space<vmem>>, vector<8x8xf32>
    tpu.vector_store %arg18[%c0_39, %c16], %73 {strides = array<i32>} : memref<8x32xf32, #tpu.memory_space<vmem>>, vector<8x8xf32>,
    %75 = vector.extract_strided_slice %65 {offsets = [3, 0, 0], sizes = [1, 8, 8], strides = [1, 1, 1]} : vector<4x8x8xf32> to vector<1x8x8xf32>
    %76 = vector.shape_cast %75 : vector<1x8x8xf32> to vector<8x8xf32>
    %c0_40 = arith.constant 0 : index
    %c24 = arith.constant 24 : index
    %77 = vector.load %arg18[%c0_40, %c24] : memref<8x32xf32, #tpu.memory_space<vmem>>, vector<8x8xf32>
    tpu.vector_store %arg18[%c0_40, %c24], %76 {strides = array<i32>} : memref<8x32xf32, #tpu.memory_space<vmem>>, vector<8x8xf32>,
    %c0_41 = arith.constant 0 : index
    %c0_42 = arith.constant 0 : index
    %78 = vector.load %arg18[%c0_41, %c0_42] : memref<8x32xf32, #tpu.memory_space<vmem>>, vector<8x32xf32>
    %79 = arith.addf %1, %78 : vector<8x32xf32>
    %c0_43 = arith.constant 0 : index
    %c0_44 = arith.constant 0 : index
    %80 = vector.load %arg11[%c0_43, %c0_44] : memref<1x32xf32, #tpu.memory_space<vmem>>, vector<1x32xf32>
    %c0_45 = arith.constant 0 : index
    %c0_46 = arith.constant 0 : index
    %81 = vector.load %arg12[%c0_45, %c0_46] : memref<1x32xf32, #tpu.memory_space<vmem>>, vector<1x32xf32>
    %cst_47 = arith.constant dense<0.000000e+00> : vector<8xf32>
    %82 = vector.multi_reduction <add>, %79, %cst_47 [1] : vector<8x32xf32> to vector<8xf32>
    %83 = vector.shape_cast %82 : vector<8xf32> to vector<8x1xf32>
    %cst_48 = arith.constant 3.200000e+01 : f32
    %84 = vector.broadcast %cst_48 : f32 to vector<8x1xf32>
    %85 = arith.divf %83, %84 : vector<8x1xf32>
    %86 = arith.mulf %79, %79 : vector<8x32xf32>
    %cst_49 = arith.constant dense<0.000000e+00> : vector<8xf32>
    %87 = vector.multi_reduction <add>, %86, %cst_49 [1] : vector<8x32xf32> to vector<8xf32>
    %88 = vector.shape_cast %87 : vector<8xf32> to vector<8x1xf32>
    %cst_50 = arith.constant 3.200000e+01 : f32
    %89 = vector.broadcast %cst_50 : f32 to vector<8x1xf32>
    %90 = arith.divf %88, %89 : vector<8x1xf32>
    %91 = arith.mulf %85, %85 : vector<8x1xf32>
    %92 = arith.subf %90, %91 : vector<8x1xf32>
    %93 = vector.broadcast %85 : vector<8x1xf32> to vector<8x32xf32>
    %94 = arith.subf %79, %93 : vector<8x32xf32>
    %cst_51 = arith.constant 9.99999997E-7 : f32
    %95 = vector.broadcast %cst_51 : f32 to vector<8x1xf32>
    %96 = arith.addf %92, %95 : vector<8x1xf32>
    %97 = math.rsqrt %96 : vector<8x1xf32>
    %98 = vector.broadcast %97 : vector<8x1xf32> to vector<8x32xf32>
    %99 = arith.mulf %94, %98 : vector<8x32xf32>
    %100 = vector.broadcast %80 : vector<1x32xf32> to vector<8x32xf32>
    %101 = arith.mulf %99, %100 : vector<8x32xf32>
    %102 = vector.broadcast %81 : vector<1x32xf32> to vector<8x32xf32>
    %103 = arith.addf %101, %102 : vector<8x32xf32>
    %104 = arith.truncf %103 : vector<8x32xf32> to vector<8x32xbf16>
    %c0_52 = arith.constant 0 : index
    %c0_53 = arith.constant 0 : index
    %105 = vector.load %arg13[%c0_52, %c0_53] : memref<32x32xbf16, #tpu.memory_space<vmem>>, vector<32x32xbf16>
    %cst_54 = arith.constant dense<0.000000e+00> : vector<8x32xf32>
    %106 = tpu.matmul %104, %105, %cst_54 {dimension_numbers = #tpu.dot_dimension_numbers<[1], [0], [0], [1], [0, 0, 1, 1], [], []>} : vector<8x32xbf16>, vector<32x32xbf16>, vector<8x32xf32> -> vector<8x32xf32>
    %c0_55 = arith.constant 0 : index
    %c0_56 = arith.constant 0 : index
    %107 = vector.load %arg14[%c0_55, %c0_56] : memref<1x32xf32, #tpu.memory_space<vmem>>, vector<1x32xf32>
    %108 = vector.broadcast %107 : vector<1x32xf32> to vector<8x32xf32>
    %109 = arith.addf %106, %108 : vector<8x32xf32>
    %cst_57 = arith.constant 5.000000e-01 : f32
    %110 = vector.broadcast %cst_57 : f32 to vector<8x32xf32>
    %111 = arith.mulf %110, %109 : vector<8x32xf32>
    %cst_58 = arith.constant 0.707106769 : f32
    %112 = vector.broadcast %cst_58 : f32 to vector<8x32xf32>
    %113 = arith.mulf %109, %112 : vector<8x32xf32>
    %114 = math.erf %113 : vector<8x32xf32>
    %cst_59 = arith.constant 1.000000e+00 : f32
    %115 = vector.broadcast %cst_59 : f32 to vector<8x32xf32>
    %116 = arith.addf %115, %114 : vector<8x32xf32>
    %117 = arith.mulf %111, %116 : vector<8x32xf32>
    %118 = arith.truncf %117 : vector<8x32xf32> to vector<8x32xbf16>
    %c0_60 = arith.constant 0 : index
    %c0_61 = arith.constant 0 : index
    %119 = vector.load %arg15[%c0_60, %c0_61] : memref<32x32xbf16, #tpu.memory_space<vmem>>, vector<32x32xbf16>
    %cst_62 = arith.constant dense<0.000000e+00> : vector<8x32xf32>
    %120 = tpu.matmul %118, %119, %cst_62 {dimension_numbers = #tpu.dot_dimension_numbers<[1], [0], [0], [1], [0, 0, 1, 1], [], []>} : vector<8x32xbf16>, vector<32x32xbf16>, vector<8x32xf32> -> vector<8x32xf32>
    %c0_63 = arith.constant 0 : index
    %c0_64 = arith.constant 0 : index
    %121 = vector.load %arg16[%c0_63, %c0_64] : memref<1x32xf32, #tpu.memory_space<vmem>>, vector<1x32xf32>
    %122 = vector.broadcast %121 : vector<1x32xf32> to vector<8x32xf32>
    %123 = arith.addf %120, %122 : vector<8x32xf32>
    %124 = arith.addf %123, %79 : vector<8x32xf32>
    %c0_65 = arith.constant 0 : index
    %c0_66 = arith.constant 0 : index
    %c0_67 = arith.constant 0 : index
    %125 = vector.load %arg17[%c0_65, %c0_66, %c0_67] : memref<1x8x32xf32, #tpu.memory_space<vmem>>, vector<1x8x32xf32>
    %126 = vector.shape_cast %125 : vector<1x8x32xf32> to vector<8x32xf32>
    %127 = vector.shape_cast %124 : vector<8x32xf32> to vector<1x8x32xf32>
    tpu.vector_store %arg17[%c0_65, %c0_66, %c0_67], %127 {strides = array<i32>} : memref<1x8x32xf32, #tpu.memory_space<vmem>>, vector<1x8x32xf32>,
    return
  }
  func.func @transform_0(%arg0: i32, %arg1: i32) -> (i32, i32, i32) {
    %c0_i32 = arith.constant 0 : i32
    %c0_i32_0 = arith.constant 0 : i32
    %c0_i32_1 = arith.constant 0 : i32
    return %arg0, %c0_i32, %c0_i32_0 : i32, i32, i32
  }
  func.func @transform_1(%arg0: i32, %arg1: i32) -> (i32, i32) {
    %c0_i32 = arith.constant 0 : i32
    %c0_i32_0 = arith.constant 0 : i32
    %c0_i32_1 = arith.constant 0 : i32
    return %c0_i32, %c0_i32_0 : i32, i32
  }
  func.func @transform_2(%arg0: i32, %arg1: i32) -> (i32, i32) {
    %c0_i32 = arith.constant 0 : i32
    %c0_i32_0 = arith.constant 0 : i32
    %c0_i32_1 = arith.constant 0 : i32
    return %c0_i32, %c0_i32_0 : i32, i32
  }
  func.func @transform_3(%arg0: i32, %arg1: i32) -> (i32, i32, i32) {
    %c0_i32 = arith.constant 0 : i32
    %c0_i32_0 = arith.constant 0 : i32
    %c0_i32_1 = arith.constant 0 : i32
    %c0_i32_2 = arith.constant 0 : i32
    return %c0_i32, %c0_i32_0, %c0_i32_1 : i32, i32, i32
  }
  func.func @transform_4(%arg0: i32, %arg1: i32) -> (i32, i32, i32) {
    %c0_i32 = arith.constant 0 : i32
    %c0_i32_0 = arith.constant 0 : i32
    %c0_i32_1 = arith.constant 0 : i32
    %c0_i32_2 = arith.constant 0 : i32
    return %c0_i32, %c0_i32_0, %c0_i32_1 : i32, i32, i32
  }
  func.func @transform_5(%arg0: i32, %arg1: i32) -> (i32, i32, i32) {
    %c0_i32 = arith.constant 0 : i32
    %c0_i32_0 = arith.constant 0 : i32
    %c0_i32_1 = arith.constant 0 : i32
    %c0_i32_2 = arith.constant 0 : i32
    return %c0_i32, %c0_i32_0, %c0_i32_1 : i32, i32, i32
  }
  func.func @transform_6(%arg0: i32, %arg1: i32) -> (i32, i32, i32) {
    %c0_i32 = arith.constant 0 : i32
    %c0_i32_0 = arith.constant 0 : i32
    %c0_i32_1 = arith.constant 0 : i32
    %c0_i32_2 = arith.constant 0 : i32
    return %c0_i32, %c0_i32_0, %c0_i32_1 : i32, i32, i32
  }
  func.func @transform_7(%arg0: i32, %arg1: i32) -> (i32, i32, i32) {
    %c0_i32 = arith.constant 0 : i32
    %c0_i32_0 = arith.constant 0 : i32
    %c0_i32_1 = arith.constant 0 : i32
    %c0_i32_2 = arith.constant 0 : i32
    return %c0_i32, %c0_i32_0, %c0_i32_1 : i32, i32, i32
  }
  func.func @transform_8(%arg0: i32, %arg1: i32) -> (i32, i32, i32) {
    %c0_i32 = arith.constant 0 : i32
    %c0_i32_0 = arith.constant 0 : i32
    %c0_i32_1 = arith.constant 0 : i32
    %c0_i32_2 = arith.constant 0 : i32
    return %c0_i32, %c0_i32_0, %c0_i32_1 : i32, i32, i32
  }
  func.func @transform_9(%arg0: i32, %arg1: i32) -> (i32, i32) {
    %c0_i32 = arith.constant 0 : i32
    %c0_i32_0 = arith.constant 0 : i32
    %c0_i32_1 = arith.constant 0 : i32
    return %c0_i32, %c0_i32_0 : i32, i32
  }
  func.func @transform_10(%arg0: i32, %arg1: i32) -> (i32, i32) {
    %c0_i32 = arith.constant 0 : i32
    %c0_i32_0 = arith.constant 0 : i32
    %c0_i32_1 = arith.constant 0 : i32
    return %c0_i32, %c0_i32_0 : i32, i32
  }
  func.func @transform_11(%arg0: i32, %arg1: i32) -> (i32, i32) {
    %c0_i32 = arith.constant 0 : i32
    %c0_i32_0 = arith.constant 0 : i32
    %c0_i32_1 = arith.constant 0 : i32
    return %c0_i32, %c0_i32_0 : i32, i32
  }
  func.func @transform_12(%arg0: i32, %arg1: i32) -> (i32, i32) {
    %c0_i32 = arith.constant 0 : i32
    %c0_i32_0 = arith.constant 0 : i32
    %c0_i32_1 = arith.constant 0 : i32
    return %c0_i32, %c0_i32_0 : i32, i32
  }
  func.func @transform_13(%arg0: i32, %arg1: i32) -> (i32, i32) {
    %c0_i32 = arith.constant 0 : i32
    %c0_i32_0 = arith.constant 0 : i32
    %c0_i32_1 = arith.constant 0 : i32
    return %c0_i32, %c0_i32_0 : i32, i32
  }
  func.func @transform_14(%arg0: i32, %arg1: i32) -> (i32, i32) {
    %c0_i32 = arith.constant 0 : i32
    %c0_i32_0 = arith.constant 0 : i32
    %c0_i32_1 = arith.constant 0 : i32
    return %c0_i32, %c0_i32_0 : i32, i32
  }
  func.func @transform_15(%arg0: i32, %arg1: i32) -> (i32, i32, i32) {
    %c0_i32 = arith.constant 0 : i32
    %c0_i32_0 = arith.constant 0 : i32
    return %arg0, %arg1, %c0_i32 : i32, i32, i32
  }
}

</mosaic_0001>

<bundles_post_ra>
// kernel: tpu_custom_call.1
= control target key start
LH: loop header
LB: loop body
LE: loop exit
PB: predicated region body
PF: predicated region fallthrough
CT: control target
= control target key end

     0   :  { %s2977_s0 = inlined_call_operand.vmem [shape: f32[2,8,32], index: 0, kind: input, shape index: {}]   ;;  %s2978_s1 = inlined_call_operand.vmem [shape: f32[1,32], index: 1, kind: input, shape index: {}]   ;;  %s2979_s2 = inlined_call_operand.vmem [shape: f32[1,32], index: 2, kind: input, shape index: {}]   ;;  %s2980_s3 = inlined_call_operand.vmem [shape: bf16[4,32,8], index: 3, kind: input, shape index: {}]   ;;  %s2981_s4 = inlined_call_operand.vmem [shape: f32[4,1,8], index: 4, kind: input, shape index: {}]   ;;  %s2982_s5 = inlined_call_operand.vmem [shape: bf16[4,32,8], index: 5, kind: input, shape index: {}]   ;;  %s2983_s6 = inlined_call_operand.vmem [shape: f32[4,1,8], index: 6, kind: input, shape index: {}]   ;;  %s2984_s7 = inlined_call_operand.vmem [shape: bf16[4,32,8], index: 7, kind: input, shape index: {}]   ;;  %s2985_s8 = inlined_call_operand.vmem [shape: f32[4,1,8], index: 8, kind: input, shape index: {}]   ;;  %s2986_s9 = inlined_call_operand.vmem [shape: f32[1,32], index: 9, kind: input, shape index: {}]   ;;  %s2987_s10 = inlined_call_operand.vmem [shape: f32[1,32], index: 10, kind: input, shape index: {}]   ;;  %s2988_s11 = inlined_call_operand.vmem [shape: bf16[32,32], index: 11, kind: input, shape index: {}]   ;;  %s2989_s12 = inlined_call_operand.vmem [shape: f32[1,32], index: 12, kind: input, shape index: {}]   ;;  %s2990_s13 = inlined_call_operand.vmem [shape: bf16[32,32], index: 13, kind: input, shape index: {}]   ;;  %s2991_s14 = inlined_call_operand.vmem [shape: f32[1,32], index: 14, kind: input, shape index: {}]   ;;  %s2992_s15 = inlined_call_operand.hbm [shape: f32[2,8,32], index: 15, kind: output, shape index: {}]  }
   0x1   :  { %2996 = sst [smem:[#allocation9_spill]] %s2977_s0 }
   0x2   :  { %2997 = sst [smem:[#allocation10_spill]] %s2978_s1 }
   0x3   :  { %2998 = sst [smem:[#allocation11_spill]] %s2979_s2 }
   0x4   :  { %20 = vsyncpa [#allocation4], 0 }
   0x5   :  { %22 = vsyncpa [#allocation4 + $0x1], 0  ;;  %s2582_s18 = smov 0   ;;  %s2584_s19 = smov 0  }
   0x6   :  { %s2586_s20 = smov 0   ;;  %s2588_s21 = smov 0  }
   0x7   :  { %s2590_s22 = smov 0   ;;  %s2592_s23 = smov 0  }
   0x8 LB: > { %2999 = sst [smem:[#allocation6_spill]] %s2474_s18  ;;  %s2009_s24 = sadd.s32 4294967295, %s2494_s23   ;;  %s2494_s23 = sphi %s2592_s23, %s28_s23   ;;  %s2490_s22 = sphi %s2590_s22, %s3009_s22   ;;  %s2486_s21 = sphi %s2588_s21, %s3008_s21   ;;  %s2482_s20 = sphi %s2586_s20, %s3012_s20   ;;  %s2478_s19 = sphi %s2584_s19, %s3011_s19   ;;  %s2474_s18 = sphi %s2582_s18, %s3010_s18  }
   0x9   : > { %3000 = sst [smem:[#allocation7_spill]] %s2490_s22  ;;  %s2010_s25 = sadd.s32 4294967294, %s2494_s23  }
   0xa   : > { %s40_s26 = sadd.s32 1, %s2490_s22  ;;  %s369_s27 = sadd.s32 1, %s2482_s20 }
   0xb   : > { %p42_p0 = scmp.ge.s32.totalorder %s40_s26, 2  ;;  %p379_p1 = scmp.ne.s32.totalorder %s2482_s20, %s2478_s19 }
   0xc   : > { %p380_p2 = scmp.eq.s32.totalorder %s2009_s24, 1  ;;  %p385_p3 = scmp.ne.s32.totalorder %s2478_s19, %s2474_s18 }
   0xd   : > { %s3014_s26 = smov (%p42_p0, %s40_s26), 0  ;;  %p386_p5 = scmp.eq.s32.totalorder %s2010_s25, 1 }
   0xe   : > { %3001 = sst [smem:[#allocation8_spill]] %s3014_s26  ;;  %p2622_p4 = por %p380_p2, %p379_p1 }
   0xf   : > { %s364_s29 = ssub.s32 %s2490_s22, %s3014_s26  ;;  %p2013_p6 = scmp.ge.s32.totalorder %s2494_s23, 1 }
  0x10   : > { %p367_p7 = scmp.eq.s32.totalorder %s364_s29, 0  ;;  %p2629_p8 = por %p386_p5, %p385_p3 }
  0x11   : > { %p453_p9 = scmp.lt.s32.totalorder %s2494_s23, 3 }
  0x12   : > { %s2635_s16 = scalar_select %p367_p7, %s2482_s20, %s369_s27  }
  0x13   : > { %p454_p10 = pnand %p2013_p6, %p453_p9 }
  0x14   : > { %p500_p11 = scmp.lt.s32.totalorder (!%p454_p10), %s2486_s21, 1  ;;  %vm508_vm0 = vcmask (!%p454_p10), 261120   ;;  %s3004_s0 = sld [smem:[#allocation9_spill]] (!%p454_p10)  ;;  %v2366_v4 = vld [vmem:[%s2980_s3] sm:$0xff] (!%p454_p10)   ;;  %v2367_v5 = vld [vmem:[%s2980_s3 + $0x10] sm:$0xff] (!%p454_p10)   ;;  %v2496_v6 = vmov (!%p454_p10), 0.0  }
  0x15   : > { %457 = sbr.rel (%p454_p10) target bundleno = 1802 (0x70a), region = 80  ;;  %2146 = vmatprep.subr.bf16.mxu0 (!%p454_p10), %v2496_v6  ;;  %2154 = vmatprep.subr.bf16.mxu1 (!%p454_p10), %v2496_v6  ;;  %v2368_v7 = vld [vmem:[%s2980_s3 + $0x8] sm:$0xff] (!%p454_p10)   ;;  %v2369_v8 = vld [vmem:[%s2980_s3 + $0x18] sm:$0xff] (!%p454_p10)   ;;  %vm2497_vm1 = vmmov (!%p454_p10), 0   ;;  %s3005_s1 = sld [smem:[#allocation10_spill]] (!%p454_p10)  ;;  %v2370_v23 = vld [vmem:[%s2980_s3 + $0x20] sm:$0xff] (!%p454_p10)  }
  0x16   : > { %2147 = vmatpush3.bf16.msra.mxu0 (!%p454_p10), %v2366_v4  ;;  %2155 = vmatpush3.bf16.msra.mxu1 (!%p454_p10), %v2367_v5  ;;  %s3006_s2 = sld [smem:[#allocation11_spill]] (!%p454_p10)  ;;  %v2371_v24 = vld [vmem:[%s2980_s3 + $0x30] sm:$0xff] (!%p454_p10)   ;;  %v2372_v26 = vld [vmem:[%s2980_s3 + $0x28] sm:$0xff] (!%p454_p10)   ;;  %v2373_v27 = vld [vmem:[%s2980_s3 + $0x38] sm:$0xff] (!%p454_p10)   ;;  %vm1315_vm2 = vcmask (!%p454_p10), 64512   ;;  %vm1543_vm3 = vcmask (!%p454_p10), 1043456  }
  0x17   : > { %2148 = vmatprep.subr.bf16.mxu0 (!%p454_p10), %v2496_v6  ;;  %2156 = vmatprep.subr.bf16.mxu1 (!%p454_p10), %v2496_v6  ;;  %v2374_v28 = vld [vmem:[%s2982_s5] sm:$0xff] (!%p454_p10)   ;;  %v2375_v29 = vld [vmem:[%s2982_s5 + $0x10] sm:$0xff] (!%p454_p10)   ;;  %v2376_v30 = vld [vmem:[%s2982_s5 + $0x8] sm:$0xff] (!%p454_p10)   ;;  %s2498_s18 = smov (!%p454_p10), 8   ;;  %vm1738_vm4 = vcmask (!%p454_p10), 130112   ;;  %vm1744_vm5 = vcmask (!%p454_p10), 195712  }
  0x18   : > { %2150 = vmatprep.mubr.msk.bf16.mxu0 (!%p454_p10), %vm2497_vm1, %v2496_v6  ;;  %2158 = vmatprep.mubr.msk.bf16.mxu1 (!%p454_p10), %vm2497_vm1, %v2496_v6  ;;  %v2377_v31 = vld [vmem:[%s2982_s5 + $0x18] sm:$0xff] (!%p454_p10)   ;;  %v2378_v32 = vld [vmem:[%s2982_s5 + $0x20] sm:$0xff] (!%p454_p10)   ;;  %v2379_v33 = vld [vmem:[%s2982_s5 + $0x30] sm:$0xff] (!%p454_p10)   ;;  %vm1750_vm6 = vcmask (!%p454_p10), 261312   ;;  %s2085_s27 = sshll.u32 (!%p454_p10), %s2486_s21, 7  ;;  %s2501_s25 = smov (!%p454_p10), [#allocation3]  }
  0x19   : > { %v2380_v34 = vld [vmem:[%s2982_s5 + $0x28] sm:$0xff] (!%p454_p10)   ;;  %v2381_v35 = vld [vmem:[%s2982_s5 + $0x38] sm:$0xff] (!%p454_p10)   ;;  %v2382_v36 = vld [vmem:[%s2984_s7] sm:$0xff] (!%p454_p10)   ;;  %s2420_s22 = sshll.u32 (!%p454_p10), %s2501_s25, 4  ;;  %s2421_s22 = int_to_ptr.vmem [resolvable:$false] %s2420_s22 }
  0x1a   : > { %2149 = vmatpush3.bf16.msra.mxu0 (!%p454_p10), %v2368_v7  ;;  %2157 = vmatpush3.bf16.msra.mxu1 (!%p454_p10), %v2369_v8  ;;  %v2383_v37 = vld [vmem:[%s2984_s7 + $0x10] sm:$0xff] (!%p454_p10)   ;;  %v2384_v38 = vld [vmem:[%s2984_s7 + $0x8] sm:$0xff] (!%p454_p10)   ;;  %v2385_v39 = vld [vmem:[%s2984_s7 + $0x18] sm:$0xff] (!%p454_p10)  }
  0x1b   : > { %2162 = vmatprep.subr.bf16.mxu0 (!%p454_p10), %v2496_v6  ;;  %2170 = vmatprep.subr.bf16.mxu1 (!%p454_p10), %v2496_v6  ;;  %v2016_v18 = vld [vmem:[%s3005_s1] ss:$0 sm:$0xff] (!%p454_p10)  ;;  %v2387_v41 = vld [vmem:[%s2984_s7 + $0x30] sm:$0xff] (!%p454_p10)   ;;  %v2388_v42 = vld [vmem:[%s2984_s7 + $0x28] sm:$0xff] (!%p454_p10)   ;;  %s2929_s1 = scalar_lea.hbm (!%p454_p10), %s2992_s15, %s2085_s27 }
  0x1c   : > { %s501_s17 = scalar_select %p500_p11, %s2486_s21, 1  ;;  %v2017_v20 = vld [vmem:[%s3006_s2] ss:$0 sm:$0xff]  ;;  %v2389_v43 = vld [vmem:[%s2984_s7 + $0x38] sm:$0xff]   ;;  %v2035_v61 = vld [vmem:[%s2983_s6 + $0x1] ss:$0 sm:$0xff] }
  0x1d   : > { %v2386_v40 = vld [vmem:[%s2984_s7 + $0x20] sm:$0xff]   ;;  %s2422_s2 = scalar_lea.vmem %s2421_s22, 256 }
  0x1e   : > { %s2015_s24 = sshll.u32 %s501_s17, 3  ;;  %v2034_v60 = vld [vmem:[%s2983_s6] ss:$0 sm:$0xff]  ;;  %v2019_v63 = vld [vmem:[%s2981_s4 + $0x1] ss:$0 sm:$0xff] }
  0x1f   : > { %s503_s26 = scalar_lea.vmem %s3004_s0, %s2015_s24  ;;  %v2018_v62 = vld [vmem:[%s2981_s4] ss:$0 sm:$0xff]  ;;  %s2500_s24 = smov 24  }
  0x20   : > { %v2642_v0 = vld [vmem:[%s503_s26] sm:$0xff]  ;;  %s2499_s26 = smov 16  }
  0x21   : > { %v509_v1 = vsel %vm508_vm0, %v2642_v0, 0.0  ;;  %v514_v2 = vmul.f32 %v2642_v0, %v2642_v0 }
  0x22   : > { %510 = vadd.xlane.f32.xlu0 %v509_v1 }
  0x23   : > { %v515_v3 = vsel %vm508_vm0, %v514_v2, 0.0 }
  0x26   : > { %516 = vadd.xlane.f32.xlu0 %v515_v3 }
  0xaf   : > { %v511_v9 = vpop.xlane.xlu0 %510 }
  0xb0   : > { %v513_v10 = vmul.f32 0.03125, %v511_v9 }
  0xb2   : > { %v519_v12 = vmul.f32 %v513_v10, %v513_v10  ;;  %v521_v16 = vsub.f32 %v2642_v0, %v513_v10 }
  0xb3   : > { %v517_v11 = vpop.xlane.xlu0 %516 }
  0xb4   : > { %v518_v13 = vmul.f32 0.03125, %v517_v11 }
  0xb6   : > { %v520_v14 = vsub.f32 %v518_v13, %v519_v12 }
  0xb8   : > { %v522_v15 = vadd.f32 1e-06, %v520_v14 }
  0xba   : > { %2394 = vrsqrt.f32 %v522_v15 }
  0xc4   : > { %v2395_v17 = vpop.eup %2394 }
  0xc5   : > { %v524_v19 = vmul.f32 %v2395_v17, %v521_v16 }
  0xc7   : > { %v531_v21 = vmul.f32 %v2016_v18, %v524_v19  ;;  %v2036_v18 = vld [vmem:[%s2983_s6 + $0x2] ss:$0 sm:$0xff] }
  0xc9   : > { %v538_v22 = vadd.f32 %v2017_v20, %v531_v21  ;;  %v2037_v21 = vld [vmem:[%s2983_s6 + $0x3] ss:$0 sm:$0xff] }
  0xcb   : > { %v2684_v25 = vpack.c.bf16 %v538_v22, %v538_v22  ;;  %v2020_v22 = vld [vmem:[%s2981_s4 + $0x2] ss:$0 sm:$0xff] }
  0xcd   : > { %2151 = vmatmul.mubr.msk.bf16.vlgmr.msra.gmra.mrb[0].mxu0 %vm508_vm0, %v2684_v25  ;;  %2159 = vmatmul.mubr.msk.bf16.vlgmr.msra.gmra.mrb[0].mxu1 %vm508_vm0, %v2684_v25 }
  0xce   : > { %2163 = vmatpush3.bf16.msra.mxu0 %v2370_v23  ;;  %2171 = vmatpush3.bf16.msra.mxu1 %v2371_v24  ;;  %v2021_v23 = vld [vmem:[%s2981_s4 + $0x3] ss:$0 sm:$0xff] }
  0xcf   : > { %2164 = vmatprep.subr.bf16.mxu0 %v2496_v6  ;;  %2172 = vmatprep.subr.bf16.mxu1 %v2496_v6 }
  0xd0   : > { %2166 = vmatprep.mubr.msk.bf16.mxu0 %vm2497_vm1, %v2496_v6  ;;  %2174 = vmatprep.mubr.msk.bf16.mxu1 %vm2497_vm1, %v2496_v6 }
  0xd2   : > { %2165 = vmatpush3.bf16.msra.mxu0 %v2372_v26  ;;  %2173 = vmatpush3.bf16.msra.mxu1 %v2373_v27 }
  0xd3   : > { %2178 = vmatprep.subr.bf16.mxu0 %v2496_v6  ;;  %2186 = vmatprep.subr.bf16.mxu1 %v2496_v6 }
  0xd5   : > { %2167 = vmatmul.mubr.msk.bf16.vlgmr.msra.gmra.mrb[4].mxu0 %vm508_vm0, %v2684_v25  ;;  %2175 = vmatmul.mubr.msk.bf16.vlgmr.msra.gmra.mrb[4].mxu1 %vm508_vm0, %v2684_v25 }
  0xd6   : > { %2179 = vmatpush3.bf16.msra.mxu0 %v2374_v28  ;;  %2187 = vmatpush3.bf16.msra.mxu1 %v2375_v29 }
  0xd7   : > { %2180 = vmatprep.subr.bf16.mxu0 %v2496_v6  ;;  %2188 = vmatprep.subr.bf16.mxu1 %v2496_v6 }
  0xd8   : > { %2182 = vmatprep.mubr.msk.bf16.mxu0 %vm2497_vm1, %v2496_v6  ;;  %2190 = vmatprep.mubr.msk.bf16.mxu1 %vm2497_vm1, %v2496_v6 }
  0xda   : > { %2181 = vmatpush3.bf16.msra.mxu0 %v2376_v30  ;;  %2189 = vmatpush3.bf16.msra.mxu1 %v2377_v31 }
  0xdb   : > { %2194 = vmatprep.subr.bf16.mxu0 %v2496_v6  ;;  %2202 = vmatprep.subr.bf16.mxu1 %v2496_v6 }
  0xdd   : > { %2183 = vmatmul.mubr.msk.bf16.vlgmr.msra.gmra.mrb[8].mxu0 %vm508_vm0, %v2684_v25  ;;  %2191 = vmatmul.mubr.msk.bf16.vlgmr.msra.gmra.mrb[8].mxu1 %vm508_vm0, %v2684_v25 }
  0xde   : > { %2195 = vmatpush3.bf16.msra.mxu0 %v2378_v32  ;;  %2203 = vmatpush3.bf16.msra.mxu1 %v2379_v33 }
  0xdf   : > { %2196 = vmatprep.subr.bf16.mxu0 %v2496_v6  ;;  %2204 = vmatprep.subr.bf16.mxu1 %v2496_v6 }
  0xe0   : > { %2198 = vmatprep.mubr.msk.bf16.mxu0 %vm2497_vm1, %v2496_v6  ;;  %2206 = vmatprep.mubr.msk.bf16.mxu1 %vm2497_vm1, %v2496_v6 }
  0xe2   : > { %2197 = vmatpush3.bf16.msra.mxu0 %v2380_v34  ;;  %2205 = vmatpush3.bf16.msra.mxu1 %v2381_v35 }
  0xe3   : > { %2210 = vmatprep.subr.bf16.mxu0 %v2496_v6  ;;  %2218 = vmatprep.subr.bf16.mxu1 %v2496_v6 }
  0xe5   : > { %2199 = vmatmul.mubr.msk.bf16.vlgmr.msra.gmra.mrb[12].mxu0 %vm508_vm0, %v2684_v25  ;;  %2207 = vmatmul.mubr.msk.bf16.vlgmr.msra.gmra.mrb[12].mxu1 %vm508_vm0, %v2684_v25 }
  0xe6   : > { %2211 = vmatpush3.bf16.msra.mxu0 %v2382_v36  ;;  %2219 = vmatpush3.bf16.msra.mxu1 %v2383_v37 }
  0xe7   : > { %2212 = vmatprep.subr.bf16.mxu0 %v2496_v6  ;;  %2220 = vmatprep.subr.bf16.mxu1 %v2496_v6 }
  0xe8   : > { %2214 = vmatprep.mubr.msk.bf16.mxu0 %vm2497_vm1, %v2496_v6  ;;  %2222 = vmatprep.mubr.msk.bf16.mxu1 %vm2497_vm1, %v2496_v6 }
  0xea   : > { %2213 = vmatpush3.bf16.msra.mxu0 %v2384_v38  ;;  %2221 = vmatpush3.bf16.msra.mxu1 %v2385_v39 }
  0xeb   : > { %2226 = vmatprep.subr.bf16.mxu0 %v2496_v6  ;;  %2234 = vmatprep.subr.bf16.mxu1 %v2496_v6 }
  0xed   : > { %2215 = vmatmul.mubr.msk.bf16.vlgmr.msra.gmra.mrb[16].mxu0 %vm508_vm0, %v2684_v25  ;;  %2223 = vmatmul.mubr.msk.bf16.vlgmr.msra.gmra.mrb[16].mxu1 %vm508_vm0, %v2684_v25 }
  0xee   : > { %2227 = vmatpush3.bf16.msra.mxu0 %v2386_v40  ;;  %2235 = vmatpush3.bf16.msra.mxu1 %v2387_v41 }
  0xef   : > { %2228 = vmatprep.subr.bf16.mxu0 %v2496_v6  ;;  %2236 = vmatprep.subr.bf16.mxu1 %v2496_v6 }
  0xf0   : > { %2230 = vmatprep.mubr.msk.bf16.mxu0 %vm2497_vm1, %v2496_v6  ;;  %2238 = vmatprep.mubr.msk.bf16.mxu1 %vm2497_vm1, %v2496_v6 }
  0xf2   : > { %2229 = vmatpush3.bf16.msra.mxu0 %v2388_v42  ;;  %2237 = vmatpush3.bf16.msra.mxu1 %v2389_v43  ;;  %v2050_v42 = vld [vmem:[%s2985_s8] ss:$0 sm:$0xff]  ;;  %v2051_v43 = vld [vmem:[%s2985_s8 + $0x1] ss:$0 sm:$0xff] }
  0xf3   : > { %2242 = vmatprep.subr.bf16.mxu0 %v2496_v6  ;;  %2248 = vmatprep.subr.bf16.mxu1 %v2496_v6 }
  0xf5   : > { %2231 = vmatmul.mubr.msk.bf16.vlgmr.msra.gmra.mrb[20].mxu0 %vm508_vm0, %v2684_v25  ;;  %2239 = vmatmul.mubr.msk.bf16.vlgmr.msra.gmra.mrb[20].mxu1 %vm508_vm0, %v2684_v25 }
  0xf6   : > { %2244 = vmatprep.mubr.msk.bf16.mxu0 %vm2497_vm1, %v2496_v6  ;;  %2250 = vmatprep.mubr.msk.bf16.mxu1 %vm2497_vm1, %v2496_v6 }
 0x1a0   : > { %v633_v44 = vpop.f32.mrb[0].mxu0  ;;  %v685_v45 = vpop.f32.mrb[0].mxu1 }
 0x1a1   : > { %v2152_v46 = vpop.f32.mrb[1].mxu0  ;;  %v2160_v47 = vpop.f32.mrb[1].mxu1  ;;  %v634_v8 = vadd.f32 %v2018_v62, %v633_v44  ;;  %v686_v9 = vadd.f32 %v2019_v63, %v685_v45  ;;  %v2052_v62 = vld [vmem:[%s2985_s8 + $0x2] ss:$0 sm:$0xff]  ;;  %v2053_v63 = vld [vmem:[%s2985_s8 + $0x3] ss:$0 sm:$0xff] }
 0x1a2   : > { %v636_v48 = vpop.f32.mrb[2].mxu0  ;;  %v688_v49 = vpop.f32.mrb[2].mxu1 }
 0x1a3   : > { %v2153_v50 = vpop.f32.mrb[3].mxu0  ;;  %v2161_v51 = vpop.f32.mrb[3].mxu1  ;;  %v1299_v19 = vmul.f32 0.35355338, %v634_v8  ;;  %v1300_v20 = vmul.f32 0.35355338, %v686_v9 }
 0x1a5   : > { %v1303_v30 = vpack.c.bf16 %v1299_v19, %v1299_v19  ;;  %v1304_v31 = vpack.c.bf16 %v1300_v20, %v1300_v20 }
 0x1a8   : > { %v737_v52 = vpop.f32.mrb[4].mxu0  ;;  %v789_v53 = vpop.f32.mrb[4].mxu1 }
 0x1a9   : > { %v2168_v54 = vpop.f32.mrb[5].mxu0  ;;  %v2176_v55 = vpop.f32.mrb[5].mxu1  ;;  %v738_v34 = vadd.f32 %v2020_v22, %v737_v52  ;;  %v790_v35 = vadd.f32 %v2021_v23, %v789_v53 }
 0x1aa   : > { %v740_v56 = vpop.f32.mrb[6].mxu0  ;;  %v792_v57 = vpop.f32.mrb[6].mxu1 }
 0x1ab   : > { %v2169_v58 = vpop.f32.mrb[7].mxu0  ;;  %v2177_v59 = vpop.f32.mrb[7].mxu1  ;;  %v1301_v44 = vmul.f32 0.35355338, %v738_v34  ;;  %v1302_v45 = vmul.f32 0.35355338, %v790_v35 }
 0x1ad   : > { %v1305_v54 = vpack.c.bf16 %v1301_v44, %v1301_v44  ;;  %v1306_v55 = vpack.c.bf16 %v1302_v45, %v1302_v45 }
 0x1b0   : > { %v885_v1 = vpop.f32.mrb[8].mxu0  ;;  %v937_v2 = vpop.f32.mrb[8].mxu1 }
 0x1b1   : > { %v886_v3 = vadd.f32 %v2034_v60, %v885_v1  ;;  %v938_v4 = vadd.f32 %v2035_v61, %v937_v2  ;;  %v2184_v5 = vpop.f32.mrb[9].mxu0  ;;  %v2192_v7 = vpop.f32.mrb[9].mxu1 }
 0x1b2   : > { %v888_v10 = vpop.f32.mrb[10].mxu0  ;;  %v940_v11 = vpop.f32.mrb[10].mxu1 }
 0x1b3   : > { %v1307_v12 = vpack.c.bf16 %v886_v3, %v886_v3  ;;  %v1308_v13 = vpack.c.bf16 %v938_v4, %v938_v4  ;;  %v2185_v14 = vpop.f32.mrb[11].mxu0  ;;  %v2193_v15 = vpop.f32.mrb[11].mxu1 }
 0x1b5   : > { %v1320_v16 = vsel %vm1315_vm2, %v1307_v12, 0  ;;  %v1366_v17 = vsel %vm1315_vm2, %v1308_v13, 0 }
 0x1b6   : > { %2243 = vmatpush3.bf16.xpose.msra.mxu0 %v1320_v16  ;;  %2249 = vmatpush3.bf16.xpose.msra.mxu1 %v1366_v17 }
 0x1b7   : > { %2254 = vmatprep.subr.bf16.mxu0 %v2496_v6  ;;  %2260 = vmatprep.subr.bf16.mxu1 %v2496_v6 }
 0x1b8   : > { %v989_v24 = vpop.f32.mrb[12].mxu0  ;;  %v1041_v25 = vpop.f32.mrb[12].mxu1 }
 0x1b9   : > { %v990_v26 = vadd.f32 %v2036_v18, %v989_v24  ;;  %v1042_v27 = vadd.f32 %v2037_v21, %v1041_v25  ;;  %v2200_v28 = vpop.f32.mrb[13].mxu0  ;;  %v2208_v29 = vpop.f32.mrb[13].mxu1 }
 0x1ba   : > { %v992_v32 = vpop.f32.mrb[14].mxu0  ;;  %v1044_v33 = vpop.f32.mrb[14].mxu1 }
 0x1bb   : > { %v1309_v36 = vpack.c.bf16 %v990_v26, %v990_v26  ;;  %v1310_v37 = vpack.c.bf16 %v1042_v27, %v1042_v27  ;;  %v2201_v38 = vpop.f32.mrb[15].mxu0  ;;  %v2209_v39 = vpop.f32.mrb[15].mxu1 }
 0x1bd   : > { %v1412_v40 = vsel %vm1315_vm2, %v1309_v36, 0  ;;  %v1458_v41 = vsel %vm1315_vm2, %v1310_v37, 0  ;;  %2245 = vmatmul.mubr.msk.bf16.vlgmr.msra.gmra.mrb[24].mxu0 %vm1315_vm2, %v1303_v30  ;;  %2251 = vmatmul.mubr.msk.bf16.vlgmr.msra.gmra.mrb[24].mxu1 %vm1315_vm2, %v1304_v31 }
 0x1be   : > { %2255 = vmatpush3.bf16.xpose.msra.mxu0 %v1412_v40  ;;  %2261 = vmatpush3.bf16.xpose.msra.mxu1 %v1458_v41 }
 0x1bf   : > { %2256 = vmatprep.mubr.msk.bf16.mxu0 %vm2497_vm1, %v2496_v6  ;;  %2262 = vmatprep.mubr.msk.bf16.mxu1 %vm2497_vm1, %v2496_v6 }
 0x1c0   : > { %v1137_v46 = vpop.f32.mrb[16].mxu0  ;;  %v1189_v47 = vpop.f32.mrb[16].mxu1  ;;  %2266 = vmatprep.subr.bf16.mxu0 %v2496_v6  ;;  %2272 = vmatprep.subr.bf16.mxu1 %v2496_v6 }
 0x1c1   : > { %v1138_v48 = vadd.f32 %v2050_v42, %v1137_v46  ;;  %v1190_v49 = vadd.f32 %v2051_v43, %v1189_v47  ;;  %v2216_v50 = vpop.f32.mrb[17].mxu0  ;;  %v2224_v51 = vpop.f32.mrb[17].mxu1 }
 0x1c2   : > { %v1140_v52 = vpop.f32.mrb[18].mxu0  ;;  %v1192_v53 = vpop.f32.mrb[18].mxu1 }
 0x1c3   : > { %v1311_v56 = vpack.c.bf16 %v1138_v48, %v1138_v48  ;;  %v1312_v57 = vpack.c.bf16 %v1190_v49, %v1190_v49  ;;  %v2217_v58 = vpop.f32.mrb[19].mxu0  ;;  %v2225_v59 = vpop.f32.mrb[19].mxu1 }
 0x1c5   : > { %v1545_v60 = vsel %vm1543_vm3, %v1311_v56, 0  ;;  %v1591_v61 = vsel %vm1543_vm3, %v1312_v57, 0  ;;  %2257 = vmatmul.mubr.msk.bf16.vlgmr.msra.gmra.mrb[28].mxu0 %vm1315_vm2, %v1305_v54  ;;  %2263 = vmatmul.mubr.msk.bf16.vlgmr.msra.gmra.mrb[28].mxu1 %vm1315_vm2, %v1306_v55 }
 0x1c6   : > { %2267 = vmatpush3.bf16.msra.mxu0 %v1545_v60  ;;  %2273 = vmatpush3.bf16.msra.mxu1 %v1591_v61 }
 0x1c7   : > { %2268 = vmatprep.mubr.msk.bf16.mxu0 %vm2497_vm1, %v2496_v6  ;;  %2278 = vmatprep.subr.bf16.mxu0 %v2496_v6 }
 0x1c8   : > { %v1241_v1 = vpop.f32.mrb[20].mxu0  ;;  %v1293_v2 = vpop.f32.mrb[20].mxu1  ;;  %2274 = vmatprep.mubr.msk.bf16.mxu1 %vm2497_vm1, %v2496_v6  ;;  %2284 = vmatprep.subr.bf16.mxu1 %v2496_v6 }
 0x1c9   : > { %v1242_v3 = vadd.f32 %v2052_v62, %v1241_v1  ;;  %v1294_v4 = vadd.f32 %v2053_v63, %v1293_v2  ;;  %v2232_v5 = vpop.f32.mrb[21].mxu0  ;;  %v2240_v7 = vpop.f32.mrb[21].mxu1 }
 0x1ca   : > { %v1244_v8 = vpop.f32.mrb[22].mxu0  ;;  %v1296_v9 = vpop.f32.mrb[22].mxu1 }
 0x1cb   : > { %v1313_v10 = vpack.c.bf16 %v1242_v3, %v1242_v3  ;;  %v1314_v11 = vpack.c.bf16 %v1294_v4, %v1294_v4  ;;  %v2233_v12 = vpop.f32.mrb[23].mxu0  ;;  %v2241_v13 = vpop.f32.mrb[23].mxu1 }
 0x1cd   : > { %v1637_v14 = vsel %vm1543_vm3, %v1313_v10, 0  ;;  %v1683_v15 = vsel %vm1543_vm3, %v1314_v11, 0 }
 0x290   : > { %v1356_v16 = vpop.f32.mrb[24].mxu0  ;;  %v1402_v17 = vpop.f32.mrb[24].mxu1 }
 0x291   : > { %v2246_v18 = vpop.f32.mrb[25].mxu0  ;;  %v2252_v19 = vpop.f32.mrb[25].mxu1  ;;  %v1500_v20 = vsel %vm1315_vm2, %v1356_v16, -inf  ;;  %v1503_v25 = vsel %vm1315_vm2, %v1402_v17, -inf }
 0x292   : > { %v1405_v21 = vpop.f32.mrb[26].mxu1  ;;  %1501 = vmax.xlane.f32.xlu1 %v1500_v20  ;;  %v1359_v22 = vpop.f32.mrb[26].mxu0 }
 0x293   : > { %v2247_v23 = vpop.f32.mrb[27].mxu0  ;;  %v2253_v24 = vpop.f32.mrb[27].mxu1 }
 0x296   : > { %1504 = vmax.xlane.f32.xlu1 %v1503_v25 }
 0x298   : > { %v1448_v26 = vpop.f32.mrb[28].mxu0  ;;  %v1494_v27 = vpop.f32.mrb[28].mxu1 }
 0x299   : > { %v2258_v28 = vpop.f32.mrb[29].mxu0  ;;  %v2264_v29 = vpop.f32.mrb[29].mxu1  ;;  %v1509_v30 = vsel %vm1315_vm2, %v1494_v27, -inf  ;;  %v1506_v31 = vsel %vm1315_vm2, %v1448_v26, -inf }
 0x29a   : > { %v1497_v32 = vpop.f32.mrb[30].mxu1  ;;  %1510 = vmax.xlane.f32.xlu1 %v1509_v30  ;;  %1507 = vmax.xlane.f32.xlu0 %v1506_v31  ;;  %v1451_v33 = vpop.f32.mrb[30].mxu0 }
 0x29b   : > { %v2259_v34 = vpop.f32.mrb[31].mxu0  ;;  %v2265_v35 = vpop.f32.mrb[31].mxu1 }
 0x29c   : > { %v2390_v34 = vld [vmem:[%s2988_s11] sm:$0xff]   ;;  %v2391_v35 = vld [vmem:[%s2988_s11 + $0x8] sm:$0xff]  }
 0x31f   : > { %v1502_v36 = vpop.xlane.xlu1 %1501 }
 0x320   : > { %v1512_v37 = vsub.f32 %v1356_v16, %v1502_v36 }
 0x322   : > { %v1516_v38 = vmul.f32 1.442695, %v1512_v37 }
 0x323   : > { %v1505_v39 = vpop.xlane.xlu1 %1504 }
 0x324   : > { %2396 = vpow2.f32 %v1516_v38  ;;  %v1513_v40 = vsub.f32 %v1402_v17, %v1505_v39 }
 0x326   : > { %v1518_v41 = vmul.f32 1.442695, %v1513_v40 }
 0x327   : > { %v1511_v42 = vpop.xlane.xlu1 %1510  ;;  %v1508_v43 = vpop.xlane.xlu0 %1507 }
 0x328   : > { %2398 = vpow2.f32 %v1518_v41  ;;  %v1515_v44 = vsub.f32 %v1494_v27, %v1511_v42  ;;  %v1514_v45 = vsub.f32 %v1448_v26, %v1508_v43 }
 0x32a   : > { %v1522_v46 = vmul.f32 1.442695, %v1515_v44  ;;  %v1520_v47 = vmul.f32 1.442695, %v1514_v45  ;;  %v2074_v44 = vld [vmem:[%s2986_s9] ss:$0 sm:$0xff] }
 0x32c   : > { %2400 = vpow2.f32 %v1522_v46  ;;  %v2075_v46 = vld [vmem:[%s2987_s10] ss:$0 sm:$0xff] }
 0x32d   : > { %2402 = vpow2.f32 %v1520_v47 }
 0x32e   : > { %v2397_v48 = vpop.eup %2396 }
 0x32f   : > { %v1536_v49 = vpack.c.bf16 %v2397_v48, %v2397_v48  ;;  %v1524_v59 = vsel %vm1315_vm2, %v2397_v48, 0.0 }
 0x331   : > { %2269 = vmatmul.mubr.msk.bf16.vlgmr.msra.gmra.mrb[32].mxu0 %vm1315_vm2, %v1536_v49 }
 0x332   : > { %v2399_v50 = vpop.eup %2398  ;;  %2279 = vmatpush3.bf16.msra.mxu0 %v1637_v14  ;;  %2280 = vmatprep.mubr.msk.bf16.mxu0 %vm2497_vm1, %v2496_v6 }
 0x333   : > { %v1527_v51 = vsel %vm1315_vm2, %v2399_v50, 0.0  ;;  %v1537_v52 = vpack.c.bf16 %v2399_v50, %v2399_v50  ;;  %2290 = vmatprep.subr.bf16.mxu0 %v2496_v6  ;;  %v2392_v50 = vld [vmem:[%s2990_s13] sm:$0xff]  }
 0x334   : > { %1528 = vadd.xlane.f32.xlu0 %v1527_v51  ;;  %v2393_v51 = vld [vmem:[%s2990_s13 + $0x8] sm:$0xff]  }
 0x335   : > { %2275 = vmatmul.mubr.msk.bf16.vlgmr.msra.gmra.mrb[32].mxu1 %vm1315_vm2, %v1537_v52  ;;  %v2076_v52 = vld [vmem:[%s2989_s12] ss:$0 sm:$0xff] }
 0x336   : > { %v2401_v53 = vpop.eup %2400  ;;  %2285 = vmatpush3.bf16.msra.mxu1 %v1683_v15  ;;  %2286 = vmatprep.mubr.msk.bf16.mxu1 %vm2497_vm1, %v2496_v6 }
 0x337   : > { %v2403_v54 = vpop.eup %2402  ;;  %v1533_v55 = vsel %vm1315_vm2, %v2401_v53, 0.0  ;;  %2298 = vmatprep.subr.bf16.mxu1 %v2496_v6  ;;  %v1539_v58 = vpack.c.bf16 %v2401_v53, %v2401_v53 }
 0x338   : > { %1534 = vadd.xlane.f32.xlu0 %v1533_v55  ;;  %v1530_v56 = vsel %vm1315_vm2, %v2403_v54, 0.0  ;;  %v1538_v57 = vpack.c.bf16 %v2403_v54, %v2403_v54 }
 0x339   : > { %1531 = vadd.xlane.f32.xlu1 %v1530_v56 }
 0x33a   : > { %2281 = vmatmul.mubr.msk.bf16.vlgmr.msra.gmra.mrb[36].mxu0 %vm1315_vm2, %v1538_v57 }
 0x33b   : > { %2294 = vmatprep.mubr.msk.bf16.mxu0 %vm2497_vm1, %v2496_v6  ;;  %2291 = vmatpush3.bf16.msra.mxu0 %v2390_v34 }
 0x33c   : > { %2292 = vmatprep.subr.bf16.mxu0 %v2496_v6 }
 0x33d   : > { %1525 = vadd.xlane.f32.xlu1 %v1524_v59  ;;  %2287 = vmatmul.mubr.msk.bf16.vlgmr.msra.gmra.mrb[36].mxu1 %vm1315_vm2, %v1539_v58 }
 0x33e   : > { %2302 = vmatprep.mubr.msk.bf16.mxu1 %vm2497_vm1, %v2496_v6  ;;  %2299 = vmatpush3.bf16.msra.mxu1 %v2392_v50 }
 0x33f   : > { %2293 = vmatpush3.bf16.msra.mxu0 %v2391_v35  ;;  %2300 = vmatprep.subr.bf16.mxu1 %v2496_v6 }
 0x342   : > { %2301 = vmatpush3.bf16.msra.mxu1 %v2393_v51 }
 0x3c1   : > { %v1529_v62 = vpop.xlane.xlu0 %1528 }
 0x3c5   : > { %v1535_v63 = vpop.xlane.xlu0 %1534 }
 0x3c6   : > { %v1532_v60 = vpop.xlane.xlu1 %1531 }
 0x3ca   : > { %v1526_v61 = vpop.xlane.xlu1 %1525 }
 0x3cb   : > { %2404 = vrcp.f32 %v1526_v61 }
 0x3cc   : > { %2406 = vrcp.f32 %v1529_v62 }
 0x3cd   : > { %2408 = vrcp.f32 %v1532_v60 }
 0x3ce   : > { %2410 = vrcp.f32 %v1535_v63  ;;  %v2080_v63 = vld [vmem:[%s2991_s14] ss:$0 sm:$0xff] }
 0x3d5   : > { %v2405_v1 = vpop.eup %2404 }
 0x3d6   : > { %v2407_v8 = vpop.eup %2406 }
 0x3d7   : > { %v2409_v14 = vpop.eup %2408 }
 0x3d8   : > { %v2411_v19 = vpop.eup %2410 }
 0x404   : > { %v1581_v2 = vpop.f32.mrb[32].mxu0 }
 0x405   : > { %v1729_v3 = vmul.f32 %v2405_v1, %v1581_v2  ;;  %v2270_v4 = vpop.f32.mrb[33].mxu0 }
 0x406   : > { %v1584_v5 = vpop.f32.mrb[34].mxu0 }
 0x407   : > { %1733 = vst.msk [vmem:[#allocation2] sm:$0xff] %vm1315_vm2, %v1729_v3  ;;  %v2271_v7 = vpop.f32.mrb[35].mxu0 }
 0x408   : > { %v1627_v9 = vpop.f32.mrb[32].mxu1 }
 0x409   : > { %v1730_v10 = vmul.f32 %v2407_v8, %v1627_v9  ;;  %v2276_v11 = vpop.f32.mrb[33].mxu1 }
 0x40a   : > { %v1630_v12 = vpop.f32.mrb[34].mxu1 }
 0x40b   : > { %v2277_v13 = vpop.f32.mrb[35].mxu1  ;;  %1735 = vrot.lane.b32.xlu0 %v1730_v10, %s2498_s18 }
 0x40d   : > { %v1673_v15 = vpop.f32.mrb[36].mxu0 }
 0x40e   : > { %v1731_v16 = vmul.f32 %v2409_v14, %v1673_v15  ;;  %v2282_v17 = vpop.f32.mrb[37].mxu0 }
 0x40f   : > { %v1676_v18 = vpop.f32.mrb[38].mxu0 }
 0x410   : > { %1741 = vrot.lane.b32.xlu1 %v1731_v16, %s2499_s26  ;;  %v2283_v20 = vpop.f32.mrb[39].mxu0  ;;  %v1719_v21 = vpop.f32.mrb[36].mxu1  ;;  %s497_s26 = sand.u32 1, %s2478_s19  }
 0x411   : > { %v1732_v22 = vmul.f32 %v2411_v19, %v1719_v21  ;;  %v2288_v23 = vpop.f32.mrb[37].mxu1  ;;  %s1927_s21 = scalar_lea.sflag [#allocation4], %s497_s26 }
 0x412   : > { %v1722_v24 = vpop.f32.mrb[38].mxu1 }
 0x413   : > { %v2289_v25 = vpop.f32.mrb[39].mxu1 }
 0x414   : > { %1747 = vrot.lane.b32.xlu1 %v1732_v22, %s2500_s24  ;;  %s2014_s24 = sshll.u32 %s497_s26, 3 }
 0x415   : > { %s499_s29 = scalar_lea.vmem [#allocation3], %s2014_s24 }
 0x416   : > { %s1941_s17 = sshll.u32 %s499_s29, 4  ;;  %s2931_s17 = int_to_ptr.vmem [resolvable:$true] %s1941_s17 }
 0x417   : > { %s2416_s24 = scalar_lea.vmem %s2931_s17, 128  ;;  %p2423_p1 = scmp.lt.s32.totalorder %s2931_s17, %s2421_s22 }
 0x418   : > { %p2417_p12 = scmp.ne.s32.totalorder %s2931_s17, %s2416_s24  ;;  %p2424_p2 = scmp.lt.s32.totalorder %s2422_s2, %s2416_s24 }
 0x41a   : > { %p2418_p13 = pnand %p2417_p12, %p2622_p4  ;;  %p2425_p3 = por %p2424_p2, %p2423_p1 }
 0x41c   : > { %p2419_p0 = pneg %p2418_p13 }
 0x41e   : > { %p2426_p5 = pnand %p2425_p3, %p2419_p0 }
 0x47d   : > { %v1736_v26 = vpop.permute.xlu0 %1735 }
 0x47e   : > { %1739 = vst.msk [vmem:[#allocation2] sm:$0xff] %vm1738_vm4, %v1736_v26 }
 0x482   : > { %v1742_v27 = vpop.permute.xlu1 %1741 }
 0x483   : > { %1745 = vst.msk [vmem:[#allocation2] sm:$0xff] %vm1744_vm5, %v1742_v27 }
 0x486   : > { %v1748_v28 = vpop.permute.xlu1 %1747 }
 0x487   : > { %1751 = vst.msk [vmem:[#allocation2] sm:$0xff] %vm1750_vm6, %v1748_v28 }
 0x48e   : > { %v1752_v29 = vld [vmem:[#allocation2] sm:$0xff] }
 0x48f   : > { %v1753_v30 = vadd.f32 %v1752_v29, %v2642_v0 }
 0x491   : > { %v1756_v31 = vsel %vm508_vm0, %v1753_v30, 0.0  ;;  %v1760_v32 = vmul.f32 %v1753_v30, %v1753_v30 }
 0x492   : > { %1757 = vadd.xlane.f32.xlu1 %v1756_v31 }
 0x493   : > { %v1761_v33 = vsel %vm508_vm0, %v1760_v32, 0.0 }
 0x494   : > { %1762 = vadd.xlane.f32.xlu0 %v1761_v33 }
 0x51f   : > { %v1758_v0 = vpop.xlane.xlu1 %1757 }
 0x520   : > { %v1759_v36 = vmul.f32 0.03125, %v1758_v0 }
 0x521   : > { %v1763_v37 = vpop.xlane.xlu0 %1762 }
 0x522   : > { %v1765_v38 = vmul.f32 %v1759_v36, %v1759_v36  ;;  %v1764_v39 = vmul.f32 0.03125, %v1763_v37  ;;  %v1767_v42 = vsub.f32 %v1753_v30, %v1759_v36 }
 0x524   : > { %v1766_v40 = vsub.f32 %v1764_v39, %v1765_v38 }
 0x526   : > { %v1768_v41 = vadd.f32 1e-06, %v1766_v40 }
 0x528   : > { %2412 = vrsqrt.f32 %v1768_v41 }
 0x532   : > { %v2413_v43 = vpop.eup %2412 }
 0x533   : > { %v1770_v45 = vmul.f32 %v2413_v43, %v1767_v42 }
 0x535   : > { %v1777_v47 = vmul.f32 %v2074_v44, %v1770_v45 }
 0x537   : > { %v1784_v48 = vadd.f32 %v2075_v46, %v1777_v47 }
 0x539   : > { %v1785_v49 = vpack.c.bf16 %v1784_v48, %v1784_v48 }
 0x53b   : > { %2295 = vmatmul.mubr.msk.bf16.vlgmr.msra.gmra.mrb[40].mxu0 %vm508_vm0, %v1785_v49 }
 0x60e   : > { %v1846_v53 = vpop.f32.mrb[40].mxu0 }
 0x60f   : > { %v1847_v54 = vadd.f32 %v2076_v52, %v1846_v53  ;;  %v2296_v55 = vpop.f32.mrb[41].mxu0 }
 0x610   : > { %v1849_v56 = vpop.f32.mrb[42].mxu0 }
 0x611   : > { %v1853_v57 = vmul.f32 0.70710677, %v1847_v54  ;;  %v2297_v58 = vpop.f32.mrb[43].mxu0  ;;  %v1852_v6 = vmul.f32 0.5, %v1847_v54 }
 0x613   : > { %2414 = verf.f32 %v1853_v57 }
 0x61d   : > { %v2415_v59 = vpop.eup %2414 }
 0x61e   : > { %v1855_v60 = vadd.f32 1.0, %v2415_v59 }
 0x620   : > { %v1856_v61 = vmul.f32 %v1855_v60, %v1852_v6 }
 0x622   : > { %v1857_v62 = vpack.c.bf16 %v1856_v61, %v1856_v61 }
 0x624   : > { %2303 = vmatmul.mubr.msk.bf16.vlgmr.msra.gmra.mrb[40].mxu1 %vm508_vm0, %v1857_v62 }
 0x6f7   : > { %v1918_v1 = vpop.f32.mrb[40].mxu1 }
 0x6f8   : > { %v1919_v2 = vadd.f32 %v2080_v63, %v1918_v1  ;;  %v2304_v3 = vpop.f32.mrb[41].mxu1 }
 0x6f9   : > { %v1921_v4 = vpop.f32.mrb[42].mxu1 }
 0x6fa   : > { %v1924_v5 = vadd.f32 %v1919_v2, %v1753_v30  ;;  %v2305_v7 = vpop.f32.mrb[43].mxu1 }
 0x6fc   : > { %1925 = vst.msk [vmem:[%s499_s29] sm:$0xff] %vm508_vm0, %v1924_v5 }
 0x6fd   : > { %2429 = shalt.err (!%p2426_p5)
}
 0x6fe   : > { %s2430_s0 = scalar_lea.hbm %s2929_s1, 128  ;;  %s2434_s29 = scalar_lea.hbm %s2992_s15, 256 }
 0x6ff   : > { %p2431_p6 = scmp.ne.s32.totalorder %s2929_s1, %s2430_s0  ;;  %p2435_p10 = scmp.lt.u32.totalorder %s2929_s1, %s2992_s15 }
 0x700   : > { %p2436_p11 = scmp.lt.u32.totalorder %s2434_s29, %s2430_s0  ;;  %p2438_p13 = scmp.lt.u32.totalorder %s2430_s0, %s2929_s1 }
 0x701   : > { %p2432_p7 = pnand %p2431_p6, %p2622_p4 }
 0x702   : > { %p2437_p12 = por %p2436_p11, %p2435_p10 }
 0x703   : > { %p2433_p9 = pneg %p2432_p7 }
 0x704   : > { %p2439_p0 = por %p2438_p13, %p2437_p12 }
 0x706   : > { %p2440_p1 = pnand %p2439_p0, %p2433_p9 }
 0x708   : > { %2443 = shalt.err (!%p2440_p1)
}
 0x709   : > { %2306 = dma.vmem_to_hbm [thread:$0]  (%p2622_p4), %s2931_s17, 128, %s2929_s1, %s1927_s21  }
 0x70a PF: > { %s3007_s2 = sld [smem:[#allocation6_spill]]  ;;  %p2312_p2 = scmp.ge.s32.totalorder %s2494_s23, 2 }
 0x70c   : > { %p2309_p3 = pnand %p2312_p2, %p2629_p8 }
 0x710   : > { %s1953_s24 = sand.u32 1, %s3007_s2  }
 0x711   : > { %s1954_s22 = scalar_lea.sflag [#allocation4], %s1953_s24 }
 0x712   : > { %2469 = dma.done.wait (!%p2309_p3), %s1954_s22, 128  }
 0x713   : > { %2471 = vsyncadd (!%p2309_p3), %s1954_s22, 4294967168  ;;  %s28_s23 = sadd.s32 1, %s2494_s23   ;;  %s3008_s21 = sld [smem:[#allocation7_spill]] }
 0x714   : > { %p25_p5 = scmp.ge.s32.totalorder %s28_s23, 4   ;;  %s3009_s22 = sld [smem:[#allocation8_spill]] }
 0x715   : > { %s3010_s18 = smov %s2478_s19  ;;  %s3011_s19 = smov %s2482_s20 }
 0x716   : > { %s3012_s20 = smov %s2635_s16  ;;  %27 = sbr.rel (!%p25_p5) target bundleno = 8 (0x8), region = 115 }
 0x71d   :  { %1959 = vsyncpa [#allocation4], 1 }
 0x71e   :  { %1961 = vsyncpa [#allocation4 + $0x1], 1 }

</bundles_post_ra>
